<compile_context>
chip_gen: v7x
topology: tpu7x:2x2x1
jax: 0.10.0
libtpu: 0.0.40
codegen_flags: <defaults>
</compile_context>

<pallas_src>
import jax
import jax.numpy as jnp
from jax.experimental import pallas as pl
from jax.experimental.pallas import tpu as pltpu


def policy_kernel(x_ref, w1_ref, b1_ref, w2_ref, b2_ref, w3_ref, b3_ref,
                  o_ref):
    # Matmul operand dtype (bf16 for MXU throughput, or f32); accumulation,
    # bias-add and ReLU are always f32.
    mm_dtype = w1_ref.dtype

    x = x_ref[...].astype(mm_dtype)

    # DeepMLPBlock 1 (input normalization pre-folded into w1/b1).
    h = jnp.dot(x, w1_ref[...], preferred_element_type=jnp.float32)
    h = jnp.maximum(h + b1_ref[...], 0.0)

    # DeepMLPBlock 2.
    h = jnp.dot(h.astype(mm_dtype), w2_ref[...],
                preferred_element_type=jnp.float32)
    h = jnp.maximum(h + b2_ref[...], 0.0)

    # Final Linear (output de-normalization pre-folded into w3/b3).
    y = jnp.dot(h.astype(mm_dtype), w3_ref[...],
                preferred_element_type=jnp.float32)
    o_ref[...] = (y + b3_ref[...]).astype(o_ref.dtype)


def fold_params(params, matmul_dtype=jnp.bfloat16):
    """Fold affine input/output normalization into the first/last Linear.

    ((x - m) / s) @ W1 + b1  ==  x @ (diag(1/s) W1) + (b1 - (m/s) @ W1)
    om + os * (h @ W3 + b3)  ==  h @ (W3 * os) + (om + os * b3)
    Weights are cast to `matmul_dtype`; biases stay f32.
    """
    inv_std = 1.0 / params["inp_std"]                       # [1, inp_dim]
    w1 = params["w1"] * inv_std.reshape(-1, 1)              # scale rows
    b1 = params["b1"] - (params["inp_mean"] * inv_std) @ params["w1"]
    w3 = params["w3"] * params["out_std"]                   # scale cols
    b3 = params["out_mean"] + params["out_std"] * params["b3"]
    return {
        "w1": w1.astype(matmul_dtype),
        "b1": b1.astype(jnp.float32),
        "w2": params["w2"].astype(matmul_dtype),
        "b2": params["b2"].astype(jnp.float32),
        "w3": w3.astype(matmul_dtype),
        "b3": b3.astype(jnp.float32),
    }


def policy_forward(obs, params, *, tile_b=256, matmul_dtype=jnp.bfloat16):
    """obs: [B, inp_dim] float32.  params: dict of weights/biases/stats."""
    B, inp_dim = obs.shape
    fp = fold_params(params, matmul_dtype)
    hidden_dim = fp["w1"].shape[1]
    out_dim = fp["w3"].shape[1]

    tile_b = min(tile_b, max(8, B))          # don't over-tile tiny batches
    grid = (pl.cdiv(B, tile_b),)

    def row_map(i):
        return (i, 0)

    def rep_map(i):
        # Constant block index -> weight fetched once, VMEM-resident across
        # the whole batch grid.
        return (0, 0)

    in_specs = [
        pl.BlockSpec((tile_b, inp_dim), row_map),           # obs tile
        pl.BlockSpec((inp_dim, hidden_dim), rep_map),       # w1 (folded)
        pl.BlockSpec((1, hidden_dim), rep_map),             # b1 (folded)
        pl.BlockSpec((hidden_dim, hidden_dim), rep_map),    # w2
        pl.BlockSpec((1, hidden_dim), rep_map),             # b2
        pl.BlockSpec((hidden_dim, out_dim), rep_map),       # w3 (folded)
        pl.BlockSpec((1, out_dim), rep_map),                # b3 (folded)
    ]
    out_specs = pl.BlockSpec((tile_b, out_dim), row_map)

    return pl.pallas_call(
        policy_kernel,
        out_shape=jax.ShapeDtypeStruct((B, out_dim), jnp.float32),
        grid_spec=pltpu.PrefetchScalarGridSpec(
            num_scalar_prefetch=0,
            grid=grid,
            in_specs=in_specs,
            out_specs=out_specs,
        ),
        compiler_params=pltpu.CompilerParams(
            dimension_semantics=("parallel",),   # shard batch tiles across TCs
            # Resident weights + a double-buffered 256-row obs/out tile are a
            # few hundred KiB; raise this when sweeping tile_b past ~8192.
            vmem_limit_bytes=32 << 20,
        ),
    )(
        obs,
        fp["w1"], fp["b1"],
        fp["w2"], fp["b2"],
        fp["w3"], fp["b3"],
    )


def init_params(key, inp_dim, out_dim, hidden_dim):
    """Deterministic synthetic parameters (shapes match Policy.__init__)."""
    ks = jax.random.split(key, 6)
    scale1 = 1.0 / jnp.sqrt(inp_dim)
    scale2 = 1.0 / jnp.sqrt(hidden_dim)
    params = {
        # fc1 (DeepMLPBlock): Linear(inp_dim, hidden_dim) stored as [in, out]
        "w1": jax.random.uniform(ks[0], (inp_dim, hidden_dim), jnp.float32,
                                 -scale1, scale1),
        "b1": jax.random.uniform(ks[1], (1, hidden_dim), jnp.float32,
                                 -scale1, scale1),
        # fc2 (DeepMLPBlock): Linear(hidden_dim, hidden_dim)
        "w2": jax.random.uniform(ks[2], (hidden_dim, hidden_dim), jnp.float32,
                                 -scale2, scale2),
        "b2": jax.random.uniform(ks[3], (1, hidden_dim), jnp.float32,
                                 -scale2, scale2),
        # final: Linear(hidden_dim, out_dim)
        "w3": jax.random.uniform(ks[4], (hidden_dim, out_dim), jnp.float32,
                                 -scale2, scale2),
        "b3": jax.random.uniform(ks[5], (1, out_dim), jnp.float32,
                                 -scale2, scale2),
    }
    # registered buffers: make the normalization stats non-trivial
    # (deterministic) so the folded (x - mean)/std and out_mean + out_std*y
    # paths are actually exercised.
    km, ks_ = jax.random.split(jax.random.fold_in(key, 7))
    params["inp_mean"] = 0.1 * jax.random.normal(km, (1, inp_dim), jnp.float32)
    params["inp_std"] = 1.0 + 0.1 * jnp.abs(
        jax.random.normal(ks_, (1, inp_dim), jnp.float32))
    params["out_mean"] = 0.05 * jnp.ones((1, out_dim), jnp.float32)
    params["out_std"] = 2.0 * jnp.ones((1, out_dim), jnp.float32)
    return params


def policy_forward_ref(obs, p):
    """Pure-JAX reference matching the original PyTorch forward (f32)."""
    h = (obs - p["inp_mean"]) / p["inp_std"]
    h = jnp.maximum(h @ p["w1"] + p["b1"], 0.0)
    h = jnp.maximum(h @ p["w2"] + p["b2"], 0.0)
    y = h @ p["w3"] + p["b3"]
    return p["out_mean"] + p["out_std"] * y


if __name__ == "__main__":
    # Shapes consistent with the module (hidden_dim=128 default); B=512 gives
    # 2 grid steps at tile_b=256 (exercises the parallel batch axis / v7x
    # megacore path).
    B, INP_DIM, OUT_DIM, HIDDEN_DIM = 512, 16, 8, 128

    key = jax.random.PRNGKey(0)
    k_obs, k_par = jax.random.split(key)

    obs = jax.random.normal(k_obs, (B, INP_DIM), jnp.float32)
    params = init_params(k_par, INP_DIM, OUT_DIM, HIDDEN_DIM)

    ref = policy_forward_ref(obs, params)

    # f32 matmul path: should match the unfolded reference to rounding error.
    actions_f32 = policy_forward(obs, params, tile_b=256,
                                 matmul_dtype=jnp.float32)
    actions_f32 = jax.block_until_ready(actions_f32)
    assert actions_f32.shape == (B, OUT_DIM)
    assert jnp.allclose(actions_f32, ref, atol=1e-4, rtol=1e-4)

    # bf16 matmul operands / f32 accumulation: the performance path.
    actions_bf16 = policy_forward(obs, params, tile_b=256,
                                  matmul_dtype=jnp.bfloat16)
    actions_bf16 = jax.block_until_ready(actions_bf16)
    assert actions_bf16.shape == (B, OUT_DIM)
    assert jnp.allclose(actions_bf16, ref, atol=5e-2, rtol=5e-2)

    print("KERNEL_OK")
</pallas_src>

<mosaic_0001>
module attributes {stable_mosaic.version = 11 : i64} {
  func.func @policy_kernel(%arg0: i32, %arg1: memref<256x16xf32, #tpu.memory_space<vmem>>, %arg2: memref<16x128xf32, #tpu.memory_space<vmem>>, %arg3: memref<1x128xf32, #tpu.memory_space<vmem>>, %arg4: memref<128x128xf32, #tpu.memory_space<vmem>>, %arg5: memref<1x128xf32, #tpu.memory_space<vmem>>, %arg6: memref<128x8xf32, #tpu.memory_space<vmem>>, %arg7: memref<1x8xf32, #tpu.memory_space<vmem>>, %arg8: memref<256x8xf32, #tpu.memory_space<vmem>>) attributes {dimension_semantics = [#tpu.dimension_semantics<parallel>], iteration_bounds = array<i64: 2>, scalar_prefetch = 0 : i64, scratch_operands = 0 : i64, tpu.core_type = #tpu.core_type<tc>, window_params = [{transform_indices = @transform_0, window_bounds = array<i64: 256, 16>}, {pipeline_mode = #tpu.pipeline_mode<synchronous>, transform_indices = @transform_1, window_bounds = array<i64: 16, 128>}, {pipeline_mode = #tpu.pipeline_mode<synchronous>, transform_indices = @transform_2, window_bounds = array<i64: 1, 128>}, {pipeline_mode = #tpu.pipeline_mode<synchronous>, transform_indices = @transform_3, window_bounds = array<i64: 128, 128>}, {pipeline_mode = #tpu.pipeline_mode<synchronous>, transform_indices = @transform_4, window_bounds = array<i64: 1, 128>}, {pipeline_mode = #tpu.pipeline_mode<synchronous>, transform_indices = @transform_5, window_bounds = array<i64: 128, 8>}, {pipeline_mode = #tpu.pipeline_mode<synchronous>, transform_indices = @transform_6, window_bounds = array<i64: 1, 8>}, {transform_indices = @transform_7, window_bounds = array<i64: 256, 8>}]} {
    %c0 = arith.constant 0 : index
    %c0_0 = arith.constant 0 : index
    %0 = vector.load %arg1[%c0, %c0_0] : memref<256x16xf32, #tpu.memory_space<vmem>>, vector<256x16xf32>
    %c0_1 = arith.constant 0 : index
    %c0_2 = arith.constant 0 : index
    %1 = vector.load %arg2[%c0_1, %c0_2] : memref<16x128xf32, #tpu.memory_space<vmem>>, vector<16x128xf32>
    %cst = arith.constant dense<0.000000e+00> : vector<256x128xf32>
    %2 = tpu.matmul %0, %1, %cst {dimension_numbers = #tpu.dot_dimension_numbers<[1], [0], [0], [1], [0, 0, 1, 1], [], []>} : vector<256x16xf32>, vector<16x128xf32>, vector<256x128xf32> -> vector<256x128xf32>
    %c0_3 = arith.constant 0 : index
    %c0_4 = arith.constant 0 : index
    %3 = vector.load %arg3[%c0_3, %c0_4] : memref<1x128xf32, #tpu.memory_space<vmem>>, vector<1x128xf32>
    %4 = vector.broadcast %3 : vector<1x128xf32> to vector<256x128xf32>
    %5 = arith.addf %2, %4 : vector<256x128xf32>
    %cst_5 = arith.constant 0.000000e+00 : f32
    %6 = vector.broadcast %cst_5 : f32 to vector<256x128xf32>
    %7 = arith.maximumf %5, %6 : vector<256x128xf32>
    %c0_6 = arith.constant 0 : index
    %c0_7 = arith.constant 0 : index
    %8 = vector.load %arg4[%c0_6, %c0_7] : memref<128x128xf32, #tpu.memory_space<vmem>>, vector<128x128xf32>
    %cst_8 = arith.constant dense<0.000000e+00> : vector<256x128xf32>
    %9 = tpu.matmul %7, %8, %cst_8 {dimension_numbers = #tpu.dot_dimension_numbers<[1], [0], [0], [1], [0, 0, 1, 1], [], []>} : vector<256x128xf32>, vector<128x128xf32>, vector<256x128xf32> -> vector<256x128xf32>
    %c0_9 = arith.constant 0 : index
    %c0_10 = arith.constant 0 : index
    %10 = vector.load %arg5[%c0_9, %c0_10] : memref<1x128xf32, #tpu.memory_space<vmem>>, vector<1x128xf32>
    %11 = vector.broadcast %10 : vector<1x128xf32> to vector<256x128xf32>
    %12 = arith.addf %9, %11 : vector<256x128xf32>
    %cst_11 = arith.constant 0.000000e+00 : f32
    %13 = vector.broadcast %cst_11 : f32 to vector<256x128xf32>
    %14 = arith.maximumf %12, %13 : vector<256x128xf32>
    %c0_12 = arith.constant 0 : index
    %c0_13 = arith.constant 0 : index
    %15 = vector.load %arg6[%c0_12, %c0_13] : memref<128x8xf32, #tpu.memory_space<vmem>>, vector<128x8xf32>
    %cst_14 = arith.constant dense<0.000000e+00> : vector<256x8xf32>
    %16 = tpu.matmul %14, %15, %cst_14 {dimension_numbers = #tpu.dot_dimension_numbers<[1], [0], [0], [1], [0, 0, 1, 1], [], []>} : vector<256x128xf32>, vector<128x8xf32>, vector<256x8xf32> -> vector<256x8xf32>
    %c0_15 = arith.constant 0 : index
    %c0_16 = arith.constant 0 : index
    %17 = vector.load %arg7[%c0_15, %c0_16] : memref<1x8xf32, #tpu.memory_space<vmem>>, vector<1x8xf32>
    %18 = vector.broadcast %17 : vector<1x8xf32> to vector<256x8xf32>
    %19 = arith.addf %16, %18 : vector<256x8xf32>
    %c0_17 = arith.constant 0 : index
    %c0_18 = arith.constant 0 : index
    %20 = vector.load %arg8[%c0_17, %c0_18] : memref<256x8xf32, #tpu.memory_space<vmem>>, vector<256x8xf32>
    tpu.vector_store %arg8[%c0_17, %c0_18], %19 {strides = array<i32>} : memref<256x8xf32, #tpu.memory_space<vmem>>, vector<256x8xf32>,
    return
  }
  func.func @transform_0(%arg0: i32) -> (i32, i32) {
    %c0_i32 = arith.constant 0 : i32
    %c0_i32_0 = arith.constant 0 : i32
    return %arg0, %c0_i32 : i32, i32
  }
  func.func @transform_1(%arg0: i32) -> (i32, i32) {
    %c0_i32 = arith.constant 0 : i32
    %c0_i32_0 = arith.constant 0 : i32
    %c0_i32_1 = arith.constant 0 : i32
    return %c0_i32, %c0_i32_0 : i32, i32
  }
  func.func @transform_2(%arg0: i32) -> (i32, i32) {
    %c0_i32 = arith.constant 0 : i32
    %c0_i32_0 = arith.constant 0 : i32
    %c0_i32_1 = arith.constant 0 : i32
    return %c0_i32, %c0_i32_0 : i32, i32
  }
  func.func @transform_3(%arg0: i32) -> (i32, i32) {
    %c0_i32 = arith.constant 0 : i32
    %c0_i32_0 = arith.constant 0 : i32
    %c0_i32_1 = arith.constant 0 : i32
    return %c0_i32, %c0_i32_0 : i32, i32
  }
  func.func @transform_4(%arg0: i32) -> (i32, i32) {
    %c0_i32 = arith.constant 0 : i32
    %c0_i32_0 = arith.constant 0 : i32
    %c0_i32_1 = arith.constant 0 : i32
    return %c0_i32, %c0_i32_0 : i32, i32
  }
  func.func @transform_5(%arg0: i32) -> (i32, i32) {
    %c0_i32 = arith.constant 0 : i32
    %c0_i32_0 = arith.constant 0 : i32
    %c0_i32_1 = arith.constant 0 : i32
    return %c0_i32, %c0_i32_0 : i32, i32
  }
  func.func @transform_6(%arg0: i32) -> (i32, i32) {
    %c0_i32 = arith.constant 0 : i32
    %c0_i32_0 = arith.constant 0 : i32
    %c0_i32_1 = arith.constant 0 : i32
    return %c0_i32, %c0_i32_0 : i32, i32
  }
  func.func @transform_7(%arg0: i32) -> (i32, i32) {
    %c0_i32 = arith.constant 0 : i32
    %c0_i32_0 = arith.constant 0 : i32
    return %arg0, %c0_i32 : i32, i32
  }
}

</mosaic_0001>

<bundles_post_ra>
// kernel: tpu_custom_call.1
= control target key start
LH: loop header
LB: loop body
LE: loop exit
PB: predicated region body
PF: predicated region fallthrough
CT: control target
= control target key end

     0   :  { %s1808_s24 = smov 0   ;;  %s2186_s0 = inlined_call_operand.vmem [shape: f32[512,16], index: 0, kind: input, shape index: {}]   ;;  %s2187_s1 = inlined_call_operand.vmem [shape: f32[16,128], index: 1, kind: input, shape index: {}]   ;;  %s2188_s2 = inlined_call_operand.vmem [shape: f32[1,128], index: 2, kind: input, shape index: {}]   ;;  %s2189_s3 = inlined_call_operand.vmem [shape: f32[128,128], index: 3, kind: input, shape index: {}]   ;;  %s2190_s4 = inlined_call_operand.vmem [shape: f32[1,128], index: 4, kind: input, shape index: {}]   ;;  %s2191_s5 = inlined_call_operand.vmem [shape: f32[128,8], index: 5, kind: input, shape index: {}]   ;;  %s2192_s6 = inlined_call_operand.vmem [shape: f32[1,8], index: 6, kind: input, shape index: {}]   ;;  %s2193_s7 = inlined_call_operand.vmem [shape: f32[512,8], index: 7, kind: output, shape index: {}]  }
   0x1 LB: > { %s1294_s25 = sadd.s32 4294967295, %s1766_s24   ;;  %p1298_p0 = scmp.ge.s32.totalorder %s1766_s24, 1  ;;  %s1766_s24 = sphi %s1808_s24, %s17_s24  }
   0x2   : > { %p238_p1 = scmp.lt.s32.totalorder %s1766_s24, 3 }
   0x4   : > { %p239_p2 = pnand %p1298_p0, %p238_p1 }
   0x5   : > { %v314_v0 = vld [vmem:[%s2187_s1] sm:$0xff] (!%p239_p2)  ;;  %v315_v1 = vld [vmem:[%s2187_s1 + $0x8] sm:$0xff] (!%p239_p2)  ;;  %s1299_s30 = sshll.u32 (!%p239_p2), %s1294_s25, 5  ;;  %vm323_vm0 = vcmask (!%p239_p2), 130048   ;;  %v679_v9 = vld [vmem:[%s2189_s3 + $0x10] sm:$0xff] (!%p239_p2)  ;;  %vm1205_vm1 = vcmask (!%p239_p2), 64512  }
   0x6   : > { %242 = sbr.rel (%p239_p2) target bundleno = 730 (0x2da), region = 48  ;;  %v677_v2 = vld [vmem:[%s2189_s3] sm:$0xff] (!%p239_p2)  ;;  %v1682_v3 = vpack.c.bf16 (!%p239_p2), %v315_v1, %v314_v0  ;;  %p271_p3 = scmp.lt.s32.totalorder (!%p239_p2), %s1299_s30, 63  ;;  %v678_v4 = vld [vmem:[%s2189_s3 + $0x8] sm:$0xff] (!%p239_p2)  ;;  %v680_v10 = vld [vmem:[%s2189_s3 + $0x18] sm:$0xff] (!%p239_p2) }
   0x7   : > { %v1686_v5 = vpack.c.bf16 (!%p239_p2), %v678_v4, %v677_v2  ;;  %v1690_v15 = vpack.c.bf16 (!%p239_p2), %v680_v10, %v679_v9  ;;  %v681_v17 = vld [vmem:[%s2189_s3 + $0x20] sm:$0xff] (!%p239_p2)  ;;  %v682_v18 = vld [vmem:[%s2189_s3 + $0x28] sm:$0xff] (!%p239_p2)  ;;  %v683_v24 = vld [vmem:[%s2189_s3 + $0x30] sm:$0xff] (!%p239_p2) }
   0x8   : > { %1683 = vmatprep.subr.bf16.mxu0 (!%p239_p2), %v1682_v3  ;;  %1750 = vmatprep.subr.bf16.mxu1 (!%p239_p2), %v1682_v3  ;;  %v1694_v23 = vpack.c.bf16 (!%p239_p2), %v682_v18, %v681_v17  ;;  %v684_v25 = vld [vmem:[%s2189_s3 + $0x38] sm:$0xff] (!%p239_p2)  ;;  %v685_v31 = vld [vmem:[%s2189_s3 + $0x40] sm:$0xff] (!%p239_p2)  ;;  %v686_v32 = vld [vmem:[%s2189_s3 + $0x48] sm:$0xff] (!%p239_p2) }
   0x9   : > { %1685 = vmatpush3.bf16.msra.mxu0 (!%p239_p2), %v1682_v3  ;;  %1751 = vmatpush3.bf16.msra.mxu1 (!%p239_p2), %v1682_v3  ;;  %v1698_v30 = vpack.c.bf16 (!%p239_p2), %v684_v25, %v683_v24  ;;  %v1702_v37 = vpack.c.bf16 (!%p239_p2), %v686_v32, %v685_v31  ;;  %v687_v38 = vld [vmem:[%s2189_s3 + $0x50] sm:$0xff] (!%p239_p2)  ;;  %v688_v39 = vld [vmem:[%s2189_s3 + $0x58] sm:$0xff] (!%p239_p2)  ;;  %v689_v45 = vld [vmem:[%s2189_s3 + $0x60] sm:$0xff] (!%p239_p2) }
   0xa   : > { %1687 = vmatprep.subr.bf16.mxu1 (!%p239_p2), %v1686_v5  ;;  %v1706_v44 = vpack.c.bf16 (!%p239_p2), %v688_v39, %v687_v38  ;;  %v690_v46 = vld [vmem:[%s2189_s3 + $0x68] sm:$0xff] (!%p239_p2)  ;;  %v691_v56 = vld [vmem:[%s2189_s3 + $0x70] sm:$0xff] (!%p239_p2)  ;;  %v692_v57 = vld [vmem:[%s2189_s3 + $0x78] sm:$0xff] (!%p239_p2) }
   0xb   : > { %v1710_v51 = vpack.c.bf16 (!%p239_p2), %v690_v46, %v689_v45  ;;  %v1714_v58 = vpack.c.bf16 (!%p239_p2), %v692_v57, %v691_v56  ;;  %v957_v59 = vld [vmem:[%s2191_s5] sm:$0xff] (!%p239_p2)  ;;  %v958_v60 = vld [vmem:[%s2191_s5 + $0x8] sm:$0xff] (!%p239_p2)  ;;  %v959_v61 = vld [vmem:[%s2191_s5 + $0x10] sm:$0xff] (!%p239_p2) }
   0xc   : > { %v1718_v62 = vpack.c.bf16 (!%p239_p2), %v958_v60, %v957_v59  ;;  %v960_v63 = vld [vmem:[%s2191_s5 + $0x18] sm:$0xff] (!%p239_p2)  ;;  %v961_v1 = vld [vmem:[%s2191_s5 + $0x20] sm:$0xff] (!%p239_p2)  ;;  %v962_v2 = vld [vmem:[%s2191_s5 + $0x28] sm:$0xff] (!%p239_p2) }
   0xd   : > { %s2195_s30 = smov (!%p271_p3, %s1299_s30), 63  ;;  %v1722_v0 = vpack.c.bf16 %v960_v63, %v959_v61  ;;  %v1726_v3 = vpack.c.bf16 %v962_v2, %v961_v1  ;;  %v963_v4 = vld [vmem:[%s2191_s5 + $0x30] sm:$0xff] }
   0xe   : > { %s1300_s12 = sshll.u32 %s2195_s30, 3  ;;  %1719 = vmatprep.subr.bf16.mxu0 %v1718_v62  ;;  %v967_v10 = vld [vmem:[%s2191_s5 + $0x50] sm:$0xff] }
   0xf   : > { %s1836_s15 = scalar_lea.vmem %s2186_s0, %s1300_s12  ;;  %s2085_s26 = scalar_lea.vmem %s2193_s7, %s1300_s12 }
  0x10   : > { %v282_v6 = vld [vmem:[%s1836_s15] sm:$0xff]  ;;  %v283_v7 = vld [vmem:[%s1836_s15 + $0x8] sm:$0xff]  ;;  %v284_v8 = vld [vmem:[%s1836_s15 + $0x10] sm:$0xff] }
  0x11   : > { %1474 = vmatprep.mubr.msk.f32.mxu0 %vm323_vm0, %v282_v6  ;;  %v285_v11 = vld [vmem:[%s1836_s15 + $0x18] sm:$0xff]  ;;  %v286_v12 = vld [vmem:[%s1836_s15 + $0x20] sm:$0xff]  ;;  %v299_v14 = vld [vmem:[%s1836_s15 + $0x88] sm:$0xff] }
  0x12   : > { %1475 = vmatmul.mubr.msk.f32.vlgmr.msra.gmra.mrb[0].mxu0 %vm323_vm0, %v283_v7  ;;  %v298_v13 = vld [vmem:[%s1836_s15 + $0x80] sm:$0xff]  ;;  %v300_v16 = vld [vmem:[%s1836_s15 + $0x90] sm:$0xff]  ;;  %v287_v19 = vld [vmem:[%s1836_s15 + $0x28] sm:$0xff] }
  0x13   : > { %1477 = vmatprep.mubr.msk.f32.mxu0 %vm323_vm0, %v284_v8  ;;  %1498 = vmatprep.mubr.msk.f32.mxu1 %vm323_vm0, %v298_v13  ;;  %v288_v20 = vld [vmem:[%s1836_s15 + $0x30] sm:$0xff]  ;;  %v301_v21 = vld [vmem:[%s1836_s15 + $0x98] sm:$0xff]  ;;  %v302_v22 = vld [vmem:[%s1836_s15 + $0xa0] sm:$0xff] }
  0x14   : > { %1499 = vmatmul.mubr.msk.f32.vlgmr.msra.gmra.mrb[0].mxu1 %vm323_vm0, %v299_v14  ;;  %v289_v26 = vld [vmem:[%s1836_s15 + $0x38] sm:$0xff]  ;;  %v290_v27 = vld [vmem:[%s1836_s15 + $0x40] sm:$0xff]  ;;  %v303_v28 = vld [vmem:[%s1836_s15 + $0xa8] sm:$0xff]  ;;  %1721 = vmatpush3.bf16.msra.mxu0 %v1718_v62 }
  0x15   : > { %1501 = vmatprep.mubr.msk.f32.mxu1 %vm323_vm0, %v300_v16  ;;  %1689 = vmatpush3.bf16.msra.mxu1 %v1686_v5  ;;  %v304_v29 = vld [vmem:[%s1836_s15 + $0xb0] sm:$0xff]  ;;  %v291_v33 = vld [vmem:[%s1836_s15 + $0x48] sm:$0xff]  ;;  %v305_v35 = vld [vmem:[%s1836_s15 + $0xb8] sm:$0xff] }
  0x16   : > { %1478 = vmatmul.mubr.msk.f32.gmra.mrb[2].mxu0 %vm323_vm0, %v285_v11  ;;  %1691 = vmatprep.subr.bf16.mxu1 %v1690_v15  ;;  %v292_v34 = vld [vmem:[%s1836_s15 + $0x50] sm:$0xff]  ;;  %v306_v36 = vld [vmem:[%s1836_s15 + $0xc0] sm:$0xff]  ;;  %v293_v40 = vld [vmem:[%s1836_s15 + $0x58] sm:$0xff] }
  0x17   : > { %1480 = vmatprep.mubr.msk.f32.mxu0 %vm323_vm0, %v286_v12  ;;  %v294_v41 = vld [vmem:[%s1836_s15 + $0x60] sm:$0xff]  ;;  %v307_v42 = vld [vmem:[%s1836_s15 + $0xc8] sm:$0xff]  ;;  %v308_v43 = vld [vmem:[%s1836_s15 + $0xd0] sm:$0xff]  ;;  %1723 = vmatprep.subr.bf16.mxu0 %v1722_v0 }
  0x18   : > { %1502 = vmatmul.mubr.msk.f32.gmra.mrb[2].mxu1 %vm323_vm0, %v301_v21  ;;  %v295_v47 = vld [vmem:[%s1836_s15 + $0x68] sm:$0xff]  ;;  %v296_v48 = vld [vmem:[%s1836_s15 + $0x70] sm:$0xff]  ;;  %v309_v49 = vld [vmem:[%s1836_s15 + $0xd8] sm:$0xff]  ;;  %1725 = vmatpush3.bf16.msra.mxu0 %v1722_v0 }
  0x19   : > { %1504 = vmatprep.mubr.msk.f32.mxu1 %vm323_vm0, %v302_v22  ;;  %1693 = vmatpush3.bf16.msra.mxu1 %v1690_v15  ;;  %v310_v50 = vld [vmem:[%s1836_s15 + $0xe0] sm:$0xff]  ;;  %v297_v52 = vld [vmem:[%s1836_s15 + $0x78] sm:$0xff]  ;;  %v311_v53 = vld [vmem:[%s1836_s15 + $0xe8] sm:$0xff] }
  0x1a   : > { %1481 = vmatmul.mubr.msk.f32.gmra.mrb[4].mxu0 %vm323_vm0, %v287_v19  ;;  %1695 = vmatprep.subr.bf16.mxu1 %v1694_v23  ;;  %v312_v54 = vld [vmem:[%s1836_s15 + $0xf0] sm:$0xff]  ;;  %v313_v55 = vld [vmem:[%s1836_s15 + $0xf8] sm:$0xff]  ;;  %v965_v7 = vld [vmem:[%s2191_s5 + $0x40] sm:$0xff] }
  0x1b   : > { %1483 = vmatprep.mubr.msk.f32.mxu0 %vm323_vm0, %v288_v20  ;;  %v964_v5 = vld [vmem:[%s2191_s5 + $0x38] sm:$0xff]  ;;  %1727 = vmatprep.subr.bf16.mxu0 %v1726_v3  ;;  %v966_v8 = vld [vmem:[%s2191_s5 + $0x48] sm:$0xff]  ;;  %v969_v13 = vld [vmem:[%s2191_s5 + $0x60] sm:$0xff] }
  0x1c   : > { %1505 = vmatmul.mubr.msk.f32.gmra.mrb[4].mxu1 %vm323_vm0, %v303_v28  ;;  %v1730_v6 = vpack.c.bf16 %v964_v5, %v963_v4  ;;  %1729 = vmatpush3.bf16.msra.mxu0 %v1726_v3  ;;  %v1734_v9 = vpack.c.bf16 %v966_v8, %v965_v7  ;;  %v968_v11 = vld [vmem:[%s2191_s5 + $0x58] sm:$0xff]  ;;  %v970_v14 = vld [vmem:[%s2191_s5 + $0x68] sm:$0xff]  ;;  %v1989_v16 = vld [vmem:[%s2188_s2] ss:$0 sm:$0xff] }
  0x1d   : > { %1507 = vmatprep.mubr.msk.f32.mxu1 %vm323_vm0, %v304_v29  ;;  %1697 = vmatpush3.bf16.msra.mxu1 %v1694_v23  ;;  %v1738_v12 = vpack.c.bf16 %v968_v11, %v967_v10  ;;  %v1742_v15 = vpack.c.bf16 %v970_v14, %v969_v13 }
  0x1e   : > { %1484 = vmatmul.mubr.msk.f32.gmra.mrb[6].mxu0 %vm323_vm0, %v289_v26  ;;  %1699 = vmatprep.subr.bf16.mxu1 %v1698_v30 }
  0x1f   : > { %1486 = vmatprep.mubr.msk.f32.mxu0 %vm323_vm0, %v290_v27  ;;  %1731 = vmatprep.subr.bf16.mxu0 %v1730_v6 }
  0x20   : > { %1508 = vmatmul.mubr.msk.f32.gmra.mrb[6].mxu1 %vm323_vm0, %v305_v35  ;;  %1733 = vmatpush3.bf16.msra.mxu0 %v1730_v6 }
  0x21   : > { %1510 = vmatprep.mubr.msk.f32.mxu1 %vm323_vm0, %v306_v36  ;;  %1701 = vmatpush3.bf16.msra.mxu1 %v1698_v30 }
  0x22   : > { %1487 = vmatmul.mubr.msk.f32.gmra.mrb[8].mxu0 %vm323_vm0, %v291_v33  ;;  %1703 = vmatprep.subr.bf16.mxu1 %v1702_v37 }
  0x23   : > { %1489 = vmatprep.mubr.msk.f32.mxu0 %vm323_vm0, %v292_v34  ;;  %1735 = vmatprep.subr.bf16.mxu0 %v1734_v9 }
  0x24   : > { %1511 = vmatmul.mubr.msk.f32.gmra.mrb[8].mxu1 %vm323_vm0, %v307_v42  ;;  %1737 = vmatpush3.bf16.msra.mxu0 %v1734_v9 }
  0x25   : > { %1513 = vmatprep.mubr.msk.f32.mxu1 %vm323_vm0, %v308_v43  ;;  %1705 = vmatpush3.bf16.msra.mxu1 %v1702_v37 }
  0x26   : > { %1490 = vmatmul.mubr.msk.f32.gmra.mrb[10].mxu0 %vm323_vm0, %v293_v40  ;;  %1707 = vmatprep.subr.bf16.mxu1 %v1706_v44 }
  0x27   : > { %1492 = vmatprep.mubr.msk.f32.mxu0 %vm323_vm0, %v294_v41  ;;  %1739 = vmatprep.subr.bf16.mxu0 %v1738_v12 }
  0x28   : > { %1514 = vmatmul.mubr.msk.f32.gmra.mrb[10].mxu1 %vm323_vm0, %v309_v49  ;;  %1741 = vmatpush3.bf16.msra.mxu0 %v1738_v12 }
  0x29   : > { %1516 = vmatprep.mubr.msk.f32.mxu1 %vm323_vm0, %v310_v50  ;;  %1709 = vmatpush3.bf16.msra.mxu1 %v1706_v44 }
  0x2a   : > { %1493 = vmatmul.mubr.msk.f32.gmra.mrb[12].mxu0 %vm323_vm0, %v295_v47  ;;  %1711 = vmatprep.subr.bf16.mxu1 %v1710_v51 }
  0x2b   : > { %1495 = vmatprep.mubr.msk.f32.mxu0 %vm323_vm0, %v296_v48  ;;  %1743 = vmatprep.subr.bf16.mxu0 %v1742_v15 }
  0x2c   : > { %1517 = vmatmul.mubr.msk.f32.gmra.mrb[12].mxu1 %vm323_vm0, %v311_v53  ;;  %1745 = vmatpush3.bf16.msra.mxu0 %v1742_v15 }
  0x2d   : > { %1519 = vmatprep.mubr.msk.f32.mxu1 %vm323_vm0, %v312_v54  ;;  %1713 = vmatpush3.bf16.msra.mxu1 %v1710_v51 }
  0x2e   : > { %1496 = vmatmul.mubr.msk.f32.gmra.mrb[14].mxu0 %vm323_vm0, %v297_v52  ;;  %1715 = vmatprep.subr.bf16.mxu1 %v1714_v58 }
  0x30   : > { %1520 = vmatmul.mubr.msk.f32.gmra.mrb[14].mxu1 %vm323_vm0, %v313_v55 }
  0x31   : > { %1717 = vmatpush3.bf16.msra.mxu1 %v1714_v58 }
  0xe5   : > { %v1476_v17 = vpop.f32.mrb[0].mxu0 }
  0xe6   : > { %v492_v18 = vadd.f32 %v1476_v17, %v1989_v16  ;;  %v486_v19 = vpop.f32.mrb[1].mxu0 }
  0xe7   : > { %v487_v20 = vadd.f32 %v1989_v16, %v486_v19  ;;  %v1994_v26 = vpop.f32.mrb[0].mxu1 }
  0xe8   : > { %v646_v23 = vmax.f32 %v492_v18, 0.0  ;;  %v566_v28 = vpop.f32.mrb[1].mxu1  ;;  %v572_v19 = vadd.f32 %v1994_v26, %v1989_v16 }
  0xe9   : > { %v645_v21 = vmax.f32 %v487_v20, 0.0  ;;  %v1479_v22 = vpop.f32.mrb[2].mxu0  ;;  %v567_v7 = vadd.f32 %v1989_v16, %v566_v28 }
  0xea   : > { %v502_v24 = vadd.f32 %v1479_v22, %v1989_v16  ;;  %v496_v25 = vpop.f32.mrb[3].mxu0 }
  0xeb   : > { %v497_v27 = vadd.f32 %v1989_v16, %v496_v25  ;;  %1554 = vmatprep.mubr.f32.mxu1 %v645_v21  ;;  %v1998_v34 = vpop.f32.mrb[2].mxu1  ;;  %v661_v15 = vmax.f32 %v567_v7, 0.0 }
  0xec   : > { %1555 = vmatmul.mubr.f32.vlgmr.msra.gmra.mrb[16].mxu1 %v646_v23  ;;  %v648_v31 = vmax.f32 %v502_v24, 0.0  ;;  %v576_v36 = vpop.f32.mrb[3].mxu1  ;;  %v662_v24 = vmax.f32 %v572_v19, 0.0  ;;  %v582_v25 = vadd.f32 %v1998_v34, %v1989_v16 }
  0xed   : > { %v647_v29 = vmax.f32 %v497_v27, 0.0  ;;  %v1482_v30 = vpop.f32.mrb[4].mxu0  ;;  %v577_v17 = vadd.f32 %v1989_v16, %v576_v36 }
  0xee   : > { %v512_v32 = vadd.f32 %v1482_v30, %v1989_v16  ;;  %v506_v33 = vpop.f32.mrb[5].mxu0 }
  0xef   : > { %v507_v35 = vadd.f32 %v1989_v16, %v506_v33  ;;  %1557 = vmatprep.mubr.f32.mxu1 %v647_v29  ;;  %v2002_v42 = vpop.f32.mrb[4].mxu1  ;;  %v663_v22 = vmax.f32 %v577_v17, 0.0  ;;  %v664_v29 = vmax.f32 %v582_v25, 0.0 }
  0xf0   : > { %1558 = vmatmul.mubr.f32.gmra.mrb[18].mxu1 %v648_v31  ;;  %v650_v39 = vmax.f32 %v512_v32, 0.0  ;;  %v586_v44 = vpop.f32.mrb[5].mxu1  ;;  %v592_v26 = vadd.f32 %v2002_v42, %v1989_v16 }
  0xf1   : > { %v649_v37 = vmax.f32 %v507_v35, 0.0  ;;  %v1485_v38 = vpop.f32.mrb[6].mxu0  ;;  %v587_v23 = vadd.f32 %v1989_v16, %v586_v44 }
  0xf2   : > { %v522_v40 = vadd.f32 %v1485_v38, %v1989_v16  ;;  %v516_v41 = vpop.f32.mrb[7].mxu0  ;;  %v666_v32 = vmax.f32 %v592_v26, 0.0 }
  0xf3   : > { %v517_v43 = vadd.f32 %v1989_v16, %v516_v41  ;;  %1560 = vmatprep.mubr.f32.mxu1 %v649_v37  ;;  %v1509_v50 = vpop.f32.mrb[6].mxu1  ;;  %v665_v27 = vmax.f32 %v587_v23, 0.0 }
  0xf4   : > { %1561 = vmatmul.mubr.f32.gmra.mrb[20].mxu1 %v650_v39  ;;  %v652_v47 = vmax.f32 %v522_v40, 0.0  ;;  %v596_v52 = vpop.f32.mrb[7].mxu1  ;;  %v602_v33 = vadd.f32 %v1509_v50, %v1989_v16  ;;  %v971_v50 = vld [vmem:[%s2191_s5 + $0x70] sm:$0xff] }
  0xf5   : > { %v651_v45 = vmax.f32 %v517_v43, 0.0  ;;  %v1488_v46 = vpop.f32.mrb[8].mxu0  ;;  %v597_v28 = vadd.f32 %v1989_v16, %v596_v52 }
  0xf6   : > { %v532_v48 = vadd.f32 %v1488_v46, %v1989_v16  ;;  %v526_v49 = vpop.f32.mrb[9].mxu0  ;;  %v668_v36 = vmax.f32 %v602_v33, 0.0 }
  0xf7   : > { %v527_v51 = vadd.f32 %v1989_v16, %v526_v49  ;;  %1563 = vmatprep.mubr.f32.mxu1 %v651_v45  ;;  %v1512_v58 = vpop.f32.mrb[8].mxu1  ;;  %v667_v30 = vmax.f32 %v597_v28, 0.0 }
  0xf8   : > { %1564 = vmatmul.mubr.f32.gmra.mrb[22].mxu1 %v652_v47  ;;  %v654_v55 = vmax.f32 %v532_v48, 0.0  ;;  %v606_v60 = vpop.f32.mrb[9].mxu1  ;;  %v612_v37 = vadd.f32 %v1512_v58, %v1989_v16 }
  0xf9   : > { %v653_v53 = vmax.f32 %v527_v51, 0.0  ;;  %v1491_v54 = vpop.f32.mrb[10].mxu0  ;;  %v607_v31 = vadd.f32 %v1989_v16, %v606_v60  ;;  %v972_v51 = vld [vmem:[%s2191_s5 + $0x78] sm:$0xff] }
  0xfa   : > { %v542_v56 = vadd.f32 %v1491_v54, %v1989_v16  ;;  %v536_v57 = vpop.f32.mrb[11].mxu0  ;;  %v670_v40 = vmax.f32 %v612_v37, 0.0  ;;  %v1746_v52 = vpack.c.bf16 %v972_v51, %v971_v50 }
  0xfb   : > { %v537_v59 = vadd.f32 %v1989_v16, %v536_v57  ;;  %1566 = vmatprep.mubr.f32.mxu1 %v653_v53  ;;  %v1515_v2 = vpop.f32.mrb[10].mxu1  ;;  %v669_v35 = vmax.f32 %v607_v31, 0.0  ;;  %v2041_v53 = vld [vmem:[%s2190_s4] ss:$0 sm:$0xff] }
  0xfc   : > { %1567 = vmatmul.mubr.f32.gmra.mrb[24].mxu1 %v654_v55  ;;  %v656_v63 = vmax.f32 %v542_v56, 0.0  ;;  %v616_v4 = vpop.f32.mrb[11].mxu1  ;;  %v622_v41 = vadd.f32 %v1515_v2, %v1989_v16  ;;  %1747 = vmatprep.subr.bf16.mxu0 %v1746_v52 }
  0xfd   : > { %v655_v61 = vmax.f32 %v537_v59, 0.0  ;;  %v1494_v62 = vpop.f32.mrb[12].mxu0  ;;  %v617_v34 = vadd.f32 %v1989_v16, %v616_v4  ;;  %1749 = vmatpush3.bf16.msra.mxu0 %v1746_v52 }
  0xfe   : > { %v552_v0 = vadd.f32 %v1494_v62, %v1989_v16  ;;  %v546_v1 = vpop.f32.mrb[13].mxu0  ;;  %v672_v44 = vmax.f32 %v622_v41, 0.0 }
  0xff   : > { %v547_v3 = vadd.f32 %v1989_v16, %v546_v1  ;;  %1569 = vmatprep.mubr.f32.mxu1 %v655_v61  ;;  %v1518_v11 = vpop.f32.mrb[12].mxu1  ;;  %v671_v38 = vmax.f32 %v617_v34, 0.0 }
 0x100   : > { %1570 = vmatmul.mubr.f32.gmra.mrb[26].mxu1 %v656_v63  ;;  %v658_v8 = vmax.f32 %v552_v0, 0.0  ;;  %v626_v13 = vpop.f32.mrb[13].mxu1  ;;  %v632_v45 = vadd.f32 %v1518_v11, %v1989_v16 }
 0x101   : > { %v657_v5 = vmax.f32 %v547_v3, 0.0  ;;  %v1497_v6 = vpop.f32.mrb[14].mxu0  ;;  %v627_v39 = vadd.f32 %v1989_v16, %v626_v13 }
 0x102   : > { %v562_v9 = vadd.f32 %v1497_v6, %v1989_v16  ;;  %v556_v10 = vpop.f32.mrb[15].mxu0  ;;  %v674_v47 = vmax.f32 %v632_v45, 0.0 }
 0x103   : > { %v557_v12 = vadd.f32 %v1989_v16, %v556_v10  ;;  %1572 = vmatprep.mubr.f32.mxu1 %v657_v5  ;;  %v1521_v20 = vpop.f32.mrb[14].mxu1  ;;  %v673_v42 = vmax.f32 %v627_v39, 0.0 }
 0x104   : > { %1573 = vmatmul.mubr.f32.gmra.mrb[28].mxu1 %v658_v8  ;;  %v660_v18 = vmax.f32 %v562_v9, 0.0  ;;  %v636_v21 = vpop.f32.mrb[15].mxu1  ;;  %v642_v48 = vadd.f32 %v1521_v20, %v1989_v16 }
 0x105   : > { %v659_v14 = vmax.f32 %v557_v12, 0.0  ;;  %v637_v43 = vadd.f32 %v1989_v16, %v636_v21 }
 0x106   : > { %v676_v49 = vmax.f32 %v642_v48, 0.0 }
 0x107   : > { %1575 = vmatprep.mubr.f32.mxu1 %v659_v14  ;;  %v675_v46 = vmax.f32 %v637_v43, 0.0 }
 0x108   : > { %1576 = vmatmul.mubr.f32.gmra.mrb[30].mxu1 %v660_v18 }
 0x109   : > { %1578 = vmatprep.mubr.f32.mxu1 %v661_v15 }
 0x10c   : > { %1579 = vmatmul.mubr.f32.gmra.mrb[32].mxu1 %v662_v24 }
 0x10d   : > { %1581 = vmatprep.mubr.f32.mxu1 %v663_v22 }
 0x110   : > { %1582 = vmatmul.mubr.f32.gmra.mrb[34].mxu1 %v664_v29 }
 0x111   : > { %1584 = vmatprep.mubr.f32.mxu1 %v665_v27 }
 0x114   : > { %1585 = vmatmul.mubr.f32.gmra.mrb[36].mxu1 %v666_v32 }
 0x115   : > { %1587 = vmatprep.mubr.f32.mxu1 %v667_v30 }
 0x118   : > { %1588 = vmatmul.mubr.f32.gmra.mrb[38].mxu1 %v668_v36 }
 0x119   : > { %1590 = vmatprep.mubr.f32.mxu1 %v669_v35 }
 0x11c   : > { %1591 = vmatmul.mubr.f32.gmra.mrb[40].mxu1 %v670_v40 }
 0x11d   : > { %1593 = vmatprep.mubr.f32.mxu1 %v671_v38 }
 0x120   : > { %1594 = vmatmul.mubr.f32.gmra.mrb[42].mxu1 %v672_v44 }
 0x121   : > { %1596 = vmatprep.mubr.f32.mxu1 %v673_v42 }
 0x124   : > { %1597 = vmatmul.mubr.f32.gmra.mrb[44].mxu1 %v674_v47 }
 0x125   : > { %1599 = vmatprep.mubr.f32.mxu1 %v675_v46 }
 0x128   : > { %1600 = vmatmul.mubr.f32.gmra.mrb[46].mxu1 %v676_v49 }
 0x1bf   : > { %v1556_v16 = vpop.f32.mrb[16].mxu1 }
 0x1c0   : > { %v772_v54 = vadd.f32 %v1556_v16, %v2041_v53  ;;  %v766_v55 = vpop.f32.mrb[17].mxu1 }
 0x1c1   : > { %v767_v56 = vadd.f32 %v2041_v53, %v766_v55 }
 0x1c2   : > { %v926_v59 = vmax.f32 %v772_v54, 0.0 }
 0x1c3   : > { %v925_v57 = vmax.f32 %v767_v56, 0.0  ;;  %v1559_v58 = vpop.f32.mrb[18].mxu1 }
 0x1c4   : > { %v782_v60 = vadd.f32 %v1559_v58, %v2041_v53  ;;  %v776_v61 = vpop.f32.mrb[19].mxu1 }
 0x1c5   : > { %v777_v62 = vadd.f32 %v2041_v53, %v776_v61  ;;  %1634 = vmatprep.mubr.f32.mxu0 %v925_v57 }
 0x1c6   : > { %1635 = vmatmul.mubr.f32.vlgmr.msra.gmra.mrb[16].mxu0 %v926_v59  ;;  %v928_v1 = vmax.f32 %v782_v60, 0.0 }
 0x1c7   : > { %v927_v63 = vmax.f32 %v777_v62, 0.0  ;;  %v1562_v0 = vpop.f32.mrb[20].mxu1 }
 0x1c8   : > { %v792_v2 = vadd.f32 %v1562_v0, %v2041_v53  ;;  %v786_v3 = vpop.f32.mrb[21].mxu1 }
 0x1c9   : > { %v787_v4 = vadd.f32 %v2041_v53, %v786_v3  ;;  %1637 = vmatprep.mubr.f32.mxu0 %v927_v63 }
 0x1ca   : > { %1638 = vmatmul.mubr.f32.gmra.mrb[18].mxu0 %v928_v1  ;;  %v930_v7 = vmax.f32 %v792_v2, 0.0 }
 0x1cb   : > { %v929_v5 = vmax.f32 %v787_v4, 0.0  ;;  %v1565_v6 = vpop.f32.mrb[22].mxu1 }
 0x1cc   : > { %v802_v8 = vadd.f32 %v1565_v6, %v2041_v53  ;;  %v796_v9 = vpop.f32.mrb[23].mxu1 }
 0x1cd   : > { %v797_v10 = vadd.f32 %v2041_v53, %v796_v9  ;;  %1640 = vmatprep.mubr.f32.mxu0 %v929_v5 }
 0x1ce   : > { %1641 = vmatmul.mubr.f32.gmra.mrb[20].mxu0 %v930_v7  ;;  %v932_v13 = vmax.f32 %v802_v8, 0.0 }
 0x1cf   : > { %v931_v11 = vmax.f32 %v797_v10, 0.0  ;;  %v1568_v12 = vpop.f32.mrb[24].mxu1 }
 0x1d0   : > { %v812_v14 = vadd.f32 %v1568_v12, %v2041_v53  ;;  %v806_v15 = vpop.f32.mrb[25].mxu1 }
 0x1d1   : > { %v807_v17 = vadd.f32 %v2041_v53, %v806_v15  ;;  %1643 = vmatprep.mubr.f32.mxu0 %v931_v11 }
 0x1d2   : > { %1644 = vmatmul.mubr.f32.gmra.mrb[22].mxu0 %v932_v13  ;;  %v934_v20 = vmax.f32 %v812_v14, 0.0 }
 0x1d3   : > { %v933_v18 = vmax.f32 %v807_v17, 0.0  ;;  %v1571_v19 = vpop.f32.mrb[26].mxu1 }
 0x1d4   : > { %v822_v21 = vadd.f32 %v1571_v19, %v2041_v53  ;;  %v816_v22 = vpop.f32.mrb[27].mxu1 }
 0x1d5   : > { %v817_v23 = vadd.f32 %v2041_v53, %v816_v22  ;;  %1646 = vmatprep.mubr.f32.mxu0 %v933_v18 }
 0x1d6   : > { %1647 = vmatmul.mubr.f32.gmra.mrb[24].mxu0 %v934_v20  ;;  %v936_v27 = vmax.f32 %v822_v21, 0.0 }
 0x1d7   : > { %v935_v24 = vmax.f32 %v817_v23, 0.0  ;;  %v1574_v25 = vpop.f32.mrb[28].mxu1  ;;  %v2078_v23 = vld [vmem:[%s2192_s6] ss:$0 sm:$0xff] }
 0x1d8   : > { %v832_v28 = vadd.f32 %v1574_v25, %v2041_v53  ;;  %v826_v29 = vpop.f32.mrb[29].mxu1 }
 0x1d9   : > { %v827_v26 = vadd.f32 %v2041_v53, %v826_v29  ;;  %1649 = vmatprep.mubr.f32.mxu0 %v935_v24 }
 0x1da   : > { %1650 = vmatmul.mubr.f32.gmra.mrb[26].mxu0 %v936_v27  ;;  %v938_v32 = vmax.f32 %v832_v28, 0.0 }
 0x1db   : > { %v937_v30 = vmax.f32 %v827_v26, 0.0  ;;  %v1577_v31 = vpop.f32.mrb[30].mxu1 }
 0x1dc   : > { %v842_v33 = vadd.f32 %v1577_v31, %v2041_v53  ;;  %v836_v35 = vpop.f32.mrb[31].mxu1 }
 0x1dd   : > { %v837_v34 = vadd.f32 %v2041_v53, %v836_v35  ;;  %1652 = vmatprep.mubr.f32.mxu0 %v937_v30 }
 0x1de   : > { %1653 = vmatmul.mubr.f32.gmra.mrb[28].mxu0 %v938_v32  ;;  %v940_v38 = vmax.f32 %v842_v33, 0.0 }
 0x1df   : > { %v939_v36 = vmax.f32 %v837_v34, 0.0  ;;  %v1580_v37 = vpop.f32.mrb[32].mxu1 }
 0x1e0   : > { %v852_v39 = vadd.f32 %v1580_v37, %v2041_v53  ;;  %v846_v40 = vpop.f32.mrb[33].mxu1 }
 0x1e1   : > { %v847_v41 = vadd.f32 %v2041_v53, %v846_v40  ;;  %1655 = vmatprep.mubr.f32.mxu0 %v939_v36 }
 0x1e2   : > { %1656 = vmatmul.mubr.f32.gmra.mrb[30].mxu0 %v940_v38  ;;  %v942_v44 = vmax.f32 %v852_v39, 0.0 }
 0x1e3   : > { %v941_v42 = vmax.f32 %v847_v41, 0.0  ;;  %v1583_v43 = vpop.f32.mrb[34].mxu1 }
 0x1e4   : > { %v862_v45 = vadd.f32 %v1583_v43, %v2041_v53  ;;  %v856_v46 = vpop.f32.mrb[35].mxu1 }
 0x1e5   : > { %v857_v47 = vadd.f32 %v2041_v53, %v856_v46  ;;  %1658 = vmatprep.mubr.f32.mxu0 %v941_v42 }
 0x1e6   : > { %1659 = vmatmul.mubr.f32.gmra.mrb[32].mxu0 %v942_v44  ;;  %v944_v50 = vmax.f32 %v862_v45, 0.0 }
 0x1e7   : > { %v943_v48 = vmax.f32 %v857_v47, 0.0  ;;  %v1586_v49 = vpop.f32.mrb[36].mxu1 }
 0x1e8   : > { %v872_v51 = vadd.f32 %v1586_v49, %v2041_v53  ;;  %v866_v52 = vpop.f32.mrb[37].mxu1 }
 0x1e9   : > { %v867_v16 = vadd.f32 %v2041_v53, %v866_v52  ;;  %1661 = vmatprep.mubr.f32.mxu0 %v943_v48 }
 0x1ea   : > { %1662 = vmatmul.mubr.f32.gmra.mrb[34].mxu0 %v944_v50  ;;  %v946_v56 = vmax.f32 %v872_v51, 0.0 }
 0x1eb   : > { %v945_v54 = vmax.f32 %v867_v16, 0.0  ;;  %v1589_v55 = vpop.f32.mrb[38].mxu1 }
 0x1ec   : > { %v882_v57 = vadd.f32 %v1589_v55, %v2041_v53  ;;  %v876_v58 = vpop.f32.mrb[39].mxu1 }
 0x1ed   : > { %v877_v59 = vadd.f32 %v2041_v53, %v876_v58  ;;  %1664 = vmatprep.mubr.f32.mxu0 %v945_v54 }
 0x1ee   : > { %1665 = vmatmul.mubr.f32.gmra.mrb[36].mxu0 %v946_v56  ;;  %v948_v62 = vmax.f32 %v882_v57, 0.0 }
 0x1ef   : > { %v947_v60 = vmax.f32 %v877_v59, 0.0  ;;  %v1592_v61 = vpop.f32.mrb[40].mxu1 }
 0x1f0   : > { %v892_v63 = vadd.f32 %v1592_v61, %v2041_v53  ;;  %v886_v0 = vpop.f32.mrb[41].mxu1 }
 0x1f1   : > { %v887_v1 = vadd.f32 %v2041_v53, %v886_v0  ;;  %1667 = vmatprep.mubr.f32.mxu0 %v947_v60 }
 0x1f2   : > { %1668 = vmatmul.mubr.f32.gmra.mrb[38].mxu0 %v948_v62  ;;  %v950_v4 = vmax.f32 %v892_v63, 0.0 }
 0x1f3   : > { %v949_v2 = vmax.f32 %v887_v1, 0.0  ;;  %v1595_v3 = vpop.f32.mrb[42].mxu1 }
 0x1f4   : > { %v902_v5 = vadd.f32 %v1595_v3, %v2041_v53  ;;  %v896_v6 = vpop.f32.mrb[43].mxu1 }
 0x1f5   : > { %v897_v7 = vadd.f32 %v2041_v53, %v896_v6  ;;  %1670 = vmatprep.mubr.f32.mxu0 %v949_v2 }
 0x1f6   : > { %1671 = vmatmul.mubr.f32.gmra.mrb[40].mxu0 %v950_v4  ;;  %v952_v10 = vmax.f32 %v902_v5, 0.0 }
 0x1f7   : > { %v951_v8 = vmax.f32 %v897_v7, 0.0  ;;  %v1598_v9 = vpop.f32.mrb[44].mxu1 }
 0x1f8   : > { %v912_v11 = vadd.f32 %v1598_v9, %v2041_v53  ;;  %v906_v12 = vpop.f32.mrb[45].mxu1 }
 0x1f9   : > { %v907_v13 = vadd.f32 %v2041_v53, %v906_v12  ;;  %1673 = vmatprep.mubr.f32.mxu0 %v951_v8 }
 0x1fa   : > { %1674 = vmatmul.mubr.f32.gmra.mrb[42].mxu0 %v952_v10  ;;  %v954_v17 = vmax.f32 %v912_v11, 0.0 }
 0x1fb   : > { %v953_v14 = vmax.f32 %v907_v13, 0.0  ;;  %v1601_v15 = vpop.f32.mrb[46].mxu1 }
 0x1fc   : > { %v922_v18 = vadd.f32 %v1601_v15, %v2041_v53  ;;  %v916_v19 = vpop.f32.mrb[47].mxu1 }
 0x1fd   : > { %v917_v20 = vadd.f32 %v2041_v53, %v916_v19  ;;  %1676 = vmatprep.mubr.f32.mxu0 %v953_v14 }
 0x1fe   : > { %1677 = vmatmul.mubr.f32.gmra.mrb[44].mxu0 %v954_v17  ;;  %v956_v22 = vmax.f32 %v922_v18, 0.0 }
 0x1ff   : > { %v955_v21 = vmax.f32 %v917_v20, 0.0 }
 0x201   : > { %1679 = vmatprep.mubr.f32.mxu0 %v955_v21 }
 0x202   : > { %1680 = vmatmul.mubr.f32.gmra.mrb[46].mxu0 %v956_v22 }
 0x299   : > { %v1636_v53 = vpop.f32.mrb[16].mxu0 }
 0x29a   : > { %v1052_v24 = vadd.f32 %v1636_v53, %v2078_v23  ;;  %v1046_v25 = vpop.f32.mrb[17].mxu0 }
 0x29b   : > { %v1047_v27 = vadd.f32 %v2078_v23, %v1046_v25 }
 0x29c   : > { %1207 = vst.msk [vmem:[%s2085_s26 + $0x8] sm:$0xff] %vm1205_vm1, %v1052_v24 }
 0x29d   : > { %1206 = vst.msk [vmem:[%s2085_s26] sm:$0xff] %vm1205_vm1, %v1047_v27  ;;  %v1639_v28 = vpop.f32.mrb[18].mxu0 }
 0x29e   : > { %v1062_v29 = vadd.f32 %v1639_v28, %v2078_v23  ;;  %v1056_v26 = vpop.f32.mrb[19].mxu0 }
 0x29f   : > { %v1057_v30 = vadd.f32 %v2078_v23, %v1056_v26 }
 0x2a0   : > { %1209 = vst.msk [vmem:[%s2085_s26 + $0x18] sm:$0xff] %vm1205_vm1, %v1062_v29 }
 0x2a1   : > { %1208 = vst.msk [vmem:[%s2085_s26 + $0x10] sm:$0xff] %vm1205_vm1, %v1057_v30  ;;  %v1642_v31 = vpop.f32.mrb[20].mxu0 }
 0x2a2   : > { %v1072_v32 = vadd.f32 %v1642_v31, %v2078_v23  ;;  %v1066_v33 = vpop.f32.mrb[21].mxu0 }
 0x2a3   : > { %v1067_v35 = vadd.f32 %v2078_v23, %v1066_v33 }
 0x2a4   : > { %1211 = vst.msk [vmem:[%s2085_s26 + $0x28] sm:$0xff] %vm1205_vm1, %v1072_v32 }
 0x2a5   : > { %1210 = vst.msk [vmem:[%s2085_s26 + $0x20] sm:$0xff] %vm1205_vm1, %v1067_v35  ;;  %v1645_v34 = vpop.f32.mrb[22].mxu0 }
 0x2a6   : > { %v1082_v36 = vadd.f32 %v1645_v34, %v2078_v23  ;;  %v1076_v37 = vpop.f32.mrb[23].mxu0 }
 0x2a7   : > { %v1077_v38 = vadd.f32 %v2078_v23, %v1076_v37 }
 0x2a8   : > { %1213 = vst.msk [vmem:[%s2085_s26 + $0x38] sm:$0xff] %vm1205_vm1, %v1082_v36 }
 0x2a9   : > { %1212 = vst.msk [vmem:[%s2085_s26 + $0x30] sm:$0xff] %vm1205_vm1, %v1077_v38  ;;  %v1648_v39 = vpop.f32.mrb[24].mxu0 }
 0x2aa   : > { %v1092_v40 = vadd.f32 %v1648_v39, %v2078_v23  ;;  %v1086_v41 = vpop.f32.mrb[25].mxu0 }
 0x2ab   : > { %v1087_v42 = vadd.f32 %v2078_v23, %v1086_v41 }
 0x2ac   : > { %1215 = vst.msk [vmem:[%s2085_s26 + $0x48] sm:$0xff] %vm1205_vm1, %v1092_v40 }
 0x2ad   : > { %1214 = vst.msk [vmem:[%s2085_s26 + $0x40] sm:$0xff] %vm1205_vm1, %v1087_v42  ;;  %v1651_v43 = vpop.f32.mrb[26].mxu0 }
 0x2ae   : > { %v1102_v44 = vadd.f32 %v1651_v43, %v2078_v23  ;;  %v1096_v45 = vpop.f32.mrb[27].mxu0 }
 0x2af   : > { %v1097_v46 = vadd.f32 %v2078_v23, %v1096_v45 }
 0x2b0   : > { %1217 = vst.msk [vmem:[%s2085_s26 + $0x58] sm:$0xff] %vm1205_vm1, %v1102_v44 }
 0x2b1   : > { %1216 = vst.msk [vmem:[%s2085_s26 + $0x50] sm:$0xff] %vm1205_vm1, %v1097_v46  ;;  %v1654_v47 = vpop.f32.mrb[28].mxu0 }
 0x2b2   : > { %v1112_v48 = vadd.f32 %v1654_v47, %v2078_v23  ;;  %v1106_v49 = vpop.f32.mrb[29].mxu0 }
 0x2b3   : > { %v1107_v50 = vadd.f32 %v2078_v23, %v1106_v49 }
 0x2b4   : > { %1219 = vst.msk [vmem:[%s2085_s26 + $0x68] sm:$0xff] %vm1205_vm1, %v1112_v48 }
 0x2b5   : > { %1218 = vst.msk [vmem:[%s2085_s26 + $0x60] sm:$0xff] %vm1205_vm1, %v1107_v50  ;;  %v1657_v51 = vpop.f32.mrb[30].mxu0 }
 0x2b6   : > { %v1122_v52 = vadd.f32 %v1657_v51, %v2078_v23  ;;  %v1116_v16 = vpop.f32.mrb[31].mxu0 }
 0x2b7   : > { %v1117_v54 = vadd.f32 %v2078_v23, %v1116_v16 }
 0x2b8   : > { %1221 = vst.msk [vmem:[%s2085_s26 + $0x78] sm:$0xff] %vm1205_vm1, %v1122_v52 }
 0x2b9   : > { %1220 = vst.msk [vmem:[%s2085_s26 + $0x70] sm:$0xff] %vm1205_vm1, %v1117_v54  ;;  %v1660_v55 = vpop.f32.mrb[32].mxu0 }
 0x2ba   : > { %v1132_v56 = vadd.f32 %v1660_v55, %v2078_v23  ;;  %v1126_v57 = vpop.f32.mrb[33].mxu0 }
 0x2bb   : > { %v1127_v58 = vadd.f32 %v2078_v23, %v1126_v57 }
 0x2bc   : > { %1223 = vst.msk [vmem:[%s2085_s26 + $0x88] sm:$0xff] %vm1205_vm1, %v1132_v56 }
 0x2bd   : > { %1222 = vst.msk [vmem:[%s2085_s26 + $0x80] sm:$0xff] %vm1205_vm1, %v1127_v58  ;;  %v1663_v59 = vpop.f32.mrb[34].mxu0 }
 0x2be   : > { %v1142_v60 = vadd.f32 %v1663_v59, %v2078_v23  ;;  %v1136_v61 = vpop.f32.mrb[35].mxu0 }
 0x2bf   : > { %v1137_v62 = vadd.f32 %v2078_v23, %v1136_v61 }
 0x2c0   : > { %1225 = vst.msk [vmem:[%s2085_s26 + $0x98] sm:$0xff] %vm1205_vm1, %v1142_v60 }
 0x2c1   : > { %1224 = vst.msk [vmem:[%s2085_s26 + $0x90] sm:$0xff] %vm1205_vm1, %v1137_v62  ;;  %v1666_v63 = vpop.f32.mrb[36].mxu0 }
 0x2c2   : > { %v1152_v0 = vadd.f32 %v1666_v63, %v2078_v23  ;;  %v1146_v1 = vpop.f32.mrb[37].mxu0 }
 0x2c3   : > { %v1147_v2 = vadd.f32 %v2078_v23, %v1146_v1 }
 0x2c4   : > { %1227 = vst.msk [vmem:[%s2085_s26 + $0xa8] sm:$0xff] %vm1205_vm1, %v1152_v0 }
 0x2c5   : > { %1226 = vst.msk [vmem:[%s2085_s26 + $0xa0] sm:$0xff] %vm1205_vm1, %v1147_v2  ;;  %v1669_v3 = vpop.f32.mrb[38].mxu0 }
 0x2c6   : > { %v1162_v4 = vadd.f32 %v1669_v3, %v2078_v23  ;;  %v1156_v5 = vpop.f32.mrb[39].mxu0 }
 0x2c7   : > { %v1157_v6 = vadd.f32 %v2078_v23, %v1156_v5 }
 0x2c8   : > { %1229 = vst.msk [vmem:[%s2085_s26 + $0xb8] sm:$0xff] %vm1205_vm1, %v1162_v4 }
 0x2c9   : > { %1228 = vst.msk [vmem:[%s2085_s26 + $0xb0] sm:$0xff] %vm1205_vm1, %v1157_v6  ;;  %v1672_v7 = vpop.f32.mrb[40].mxu0 }
 0x2ca   : > { %v1172_v8 = vadd.f32 %v1672_v7, %v2078_v23  ;;  %v1166_v9 = vpop.f32.mrb[41].mxu0 }
 0x2cb   : > { %v1167_v10 = vadd.f32 %v2078_v23, %v1166_v9 }
 0x2cc   : > { %1231 = vst.msk [vmem:[%s2085_s26 + $0xc8] sm:$0xff] %vm1205_vm1, %v1172_v8 }
 0x2cd   : > { %1230 = vst.msk [vmem:[%s2085_s26 + $0xc0] sm:$0xff] %vm1205_vm1, %v1167_v10  ;;  %v1675_v11 = vpop.f32.mrb[42].mxu0 }
 0x2ce   : > { %v1182_v12 = vadd.f32 %v1675_v11, %v2078_v23  ;;  %v1176_v13 = vpop.f32.mrb[43].mxu0 }
 0x2cf   : > { %v1177_v14 = vadd.f32 %v2078_v23, %v1176_v13 }
 0x2d0   : > { %1233 = vst.msk [vmem:[%s2085_s26 + $0xd8] sm:$0xff] %vm1205_vm1, %v1182_v12 }
 0x2d1   : > { %1232 = vst.msk [vmem:[%s2085_s26 + $0xd0] sm:$0xff] %vm1205_vm1, %v1177_v14  ;;  %v1678_v15 = vpop.f32.mrb[44].mxu0 }
 0x2d2   : > { %v1192_v17 = vadd.f32 %v1678_v15, %v2078_v23  ;;  %v1186_v18 = vpop.f32.mrb[45].mxu0 }
 0x2d3   : > { %v1187_v19 = vadd.f32 %v2078_v23, %v1186_v18 }
 0x2d4   : > { %1235 = vst.msk [vmem:[%s2085_s26 + $0xe8] sm:$0xff] %vm1205_vm1, %v1192_v17 }
 0x2d5   : > { %1234 = vst.msk [vmem:[%s2085_s26 + $0xe0] sm:$0xff] %vm1205_vm1, %v1187_v19  ;;  %v1681_v20 = vpop.f32.mrb[46].mxu0 }
 0x2d6   : > { %v1202_v21 = vadd.f32 %v1681_v20, %v2078_v23  ;;  %v1196_v22 = vpop.f32.mrb[47].mxu0 }
 0x2d7   : > { %v1197_v53 = vadd.f32 %v2078_v23, %v1196_v22 }
 0x2d8   : > { %1237 = vst.msk [vmem:[%s2085_s26 + $0xf8] sm:$0xff] %vm1205_vm1, %v1202_v21 }
 0x2d9   : > { %1236 = vst.msk [vmem:[%s2085_s26 + $0xf0] sm:$0xff] %vm1205_vm1, %v1197_v53 }
 0x2da PF: > { %s17_s24 = sadd.s32 1, %s1766_s24  }
 0x2db   : > { %p14_p4 = scmp.ge.s32.totalorder %s17_s24, 4  }
 0x2dd   :  { %16 = sbr.rel (!%p14_p4) target bundleno = 1 (0x1), region = 78 }

</bundles_post_ra>
